<compile_context>
chip_gen: v7x
topology: tpu7x:2x2x1
jax: 0.10.0
libtpu: 0.0.40
codegen_flags: <defaults>
</compile_context>

<pallas_src>
import jax
import jax.numpy as jnp
from jax.experimental import pallas as pl
from jax.experimental.pallas import tpu as pltpu

_LANE = 128
_SUBLANE = 8


def _round_up(x, m):
    return ((x + m - 1) // m) * m


def qfunction_kernel(obs_ref, act_ref, w1o_ref, w1a_ref, b1_ref,
                     w2_ref, b2_ref, w3_ref, b3_ref, o_ref):
    # Layer 1: split-weight form of concat([obs, act]) @ W1 + b1, then ReLU.
    h1 = (jnp.dot(obs_ref[...], w1o_ref[...], preferred_element_type=jnp.float32)
          + jnp.dot(act_ref[...], w1a_ref[...], preferred_element_type=jnp.float32)
          + b1_ref[...])
    h1 = jnp.maximum(h1, 0.0)
    # Layer 2.
    h2 = jnp.dot(h1, w2_ref[...], preferred_element_type=jnp.float32) + b2_ref[...]
    h2 = jnp.maximum(h2, 0.0)
    # Layer 3: lane-dense padded output block; only column 0 carries Q.
    q = jnp.dot(h2, w3_ref[...], preferred_element_type=jnp.float32) + b3_ref[...]
    o_ref[...] = q.astype(o_ref.dtype)


def pack_params(params, obs_dim):
    """Split w1 by input source and zero-pad feature dims to lane-dense shapes.

    params: (w1 (D,H), b1 (1,H), w2 (H,H), b2 (1,H), w3 (H,1), b3 (1,1)),
    weights stored as (in_features, out_features). Done once at init time.
    """
    w1, b1, w2, b2, w3, b3 = params
    _, H = w1.shape
    h_pad = _round_up(max(H, _LANE), _LANE)
    out_pad = _LANE

    w1o = jnp.pad(w1[:obs_dim], ((0, 0), (0, h_pad - H)))
    w1a = jnp.pad(w1[obs_dim:], ((0, 0), (0, h_pad - H)))
    b1p = jnp.pad(b1, ((0, 0), (0, h_pad - H)))          # zero bias in pad lanes
    w2p = jnp.pad(w2, ((0, h_pad - H), (0, h_pad - H)))
    b2p = jnp.pad(b2, ((0, 0), (0, h_pad - H)))
    w3p = jnp.pad(w3, ((0, h_pad - H), (0, out_pad - w3.shape[1])))
    b3p = jnp.pad(b3, ((0, 0), (0, out_pad - b3.shape[1])))
    return (w1o, w1a, b1p, w2p, b2p, w3p, b3p)


def qfunction_forward(obs, action, packed_params, *, tile_b=256):
    """obs: (B, obs_dim), action: (B, action_dim) -> (B, 1) float32."""
    assert obs.shape[0] == action.shape[0]
    B, obs_dim = obs.shape
    act_dim = action.shape[1]
    w1o, w1a, b1, w2, b2, w3, b3 = packed_params
    h_pad = w1o.shape[1]
    out_pad = w3.shape[1]

    # Batch tiling: tile_b rows per grid step (<=256 keeps f32 intermediates
    # well below vreg/VMEM pressure even with H padded to 128+).
    tb = min(tile_b, _round_up(B, _SUBLANE))
    b_pad = _round_up(B, tb)
    if b_pad != B:
        obs = jnp.pad(obs, ((0, b_pad - B), (0, 0)))
        action = jnp.pad(action, ((0, b_pad - B), (0, 0)))

    grid = (b_pad // tb,)

    flops = 2 * b_pad * ((obs_dim + act_dim) * h_pad + h_pad * h_pad + h_pad * out_pad)
    bytes_accessed = 4 * (obs.size + action.size + b_pad * out_pad
                          + w1o.size + w1a.size + b1.size
                          + w2.size + b2.size + w3.size + b3.size)

    out = pl.pallas_call(
        qfunction_kernel,
        out_shape=jax.ShapeDtypeStruct((b_pad, out_pad), jnp.float32),
        grid=grid,
        in_specs=[
            # Activations: tiled over the batch grid axis.
            pl.BlockSpec((tb, obs_dim), lambda i: (i, 0)),
            pl.BlockSpec((tb, act_dim), lambda i: (i, 0)),
            # Weights / biases: constant index_map -> stay VMEM-resident.
            pl.BlockSpec((obs_dim, h_pad), lambda i: (0, 0)),
            pl.BlockSpec((act_dim, h_pad), lambda i: (0, 0)),
            pl.BlockSpec((1, h_pad), lambda i: (0, 0)),
            pl.BlockSpec((h_pad, h_pad), lambda i: (0, 0)),
            pl.BlockSpec((1, h_pad), lambda i: (0, 0)),
            pl.BlockSpec((h_pad, out_pad), lambda i: (0, 0)),
            pl.BlockSpec((1, out_pad), lambda i: (0, 0)),
        ],
        out_specs=pl.BlockSpec((tb, out_pad), lambda i: (i, 0)),
        compiler_params=pltpu.CompilerParams(
            dimension_semantics=("parallel",),
        ),
        cost_estimate=pl.CostEstimate(
            flops=flops, transcendentals=0, bytes_accessed=bytes_accessed),
    )(obs, action, w1o, w1a, b1, w2, b2, w3, b3)

    # Drop batch padding and the 127 zero output lanes.
    return out[:B, :1]


def init_params(key, obs_dim, action_dim, hidden_dim):
    """Deterministic synthetic init (uniform, PyTorch-Linear-like fan_in bound)."""
    d_in = obs_dim + action_dim
    ks = jax.random.split(key, 6)

    def lin(kw, kb, fan_in, fan_out):
        bound = 1.0 / jnp.sqrt(jnp.float32(fan_in))
        # Stored as (in, out) — transposed relative to PyTorch's (out, in).
        w = jax.random.uniform(kw, (fan_in, fan_out), jnp.float32, -bound, bound)
        b = jax.random.uniform(kb, (1, fan_out), jnp.float32, -bound, bound)
        return w, b

    w1, b1 = lin(ks[0], ks[1], d_in, hidden_dim)
    w2, b2 = lin(ks[2], ks[3], hidden_dim, hidden_dim)
    w3, b3 = lin(ks[4], ks[5], hidden_dim, 1)
    return (w1, b1, w2, b2, w3, b3)


if __name__ == "__main__":
    obs_dim, action_dim, hidden_dim, batch = 16, 8, 32, 8

    key = jax.random.PRNGKey(0)
    k_obs, k_act, k_params = jax.random.split(key, 3)
    obs = jax.random.normal(k_obs, (batch, obs_dim), jnp.float32)
    action = jax.random.normal(k_act, (batch, action_dim), jnp.float32)
    params = init_params(k_params, obs_dim, action_dim, hidden_dim)
    packed = pack_params(params, obs_dim)   # split/pad once at init time

    q = qfunction_forward(obs, action, packed)
    jax.block_until_ready(q)

    # Reference check in plain JAX (same math as the PyTorch trunk).
    x = jnp.concatenate([obs, action], axis=1)
    w1, b1, w2, b2, w3, b3 = params
    h1 = jnp.maximum(x @ w1 + b1, 0.0)
    h2 = jnp.maximum(h1 @ w2 + b2, 0.0)
    q_ref = h2 @ w3 + b3
    assert q.shape == (batch, 1)
    assert jnp.allclose(q, q_ref, atol=1e-5, rtol=1e-5)

    # TODO(synk): QFunction.log() (parameter logging) is host-side bookkeeping,
    # not part of the forward pass, so it is intentionally not ported.
    print("KERNEL_OK")
</pallas_src>

<mosaic_0001>
module attributes {stable_mosaic.version = 11 : i64} {
  func.func @qfunction_kernel(%arg0: i32, %arg1: memref<8x16xf32, #tpu.memory_space<vmem>>, %arg2: memref<8x8xf32, #tpu.memory_space<vmem>>, %arg3: memref<16x128xf32, #tpu.memory_space<vmem>>, %arg4: memref<8x128xf32, #tpu.memory_space<vmem>>, %arg5: memref<1x128xf32, #tpu.memory_space<vmem>>, %arg6: memref<128x128xf32, #tpu.memory_space<vmem>>, %arg7: memref<1x128xf32, #tpu.memory_space<vmem>>, %arg8: memref<128x128xf32, #tpu.memory_space<vmem>>, %arg9: memref<1x128xf32, #tpu.memory_space<vmem>>, %arg10: memref<8x128xf32, #tpu.memory_space<vmem>>) attributes {dimension_semantics = [#tpu.dimension_semantics<parallel>], iteration_bounds = array<i64: 1>, scalar_prefetch = 0 : i64, scratch_operands = 0 : i64, tpu.core_type = #tpu.core_type<tc>, window_params = [{transform_indices = @transform_0, window_bounds = array<i64: 8, 16>}, {transform_indices = @transform_1, window_bounds = array<i64: 8, 8>}, {pipeline_mode = #tpu.pipeline_mode<synchronous>, transform_indices = @transform_2, window_bounds = array<i64: 16, 128>}, {pipeline_mode = #tpu.pipeline_mode<synchronous>, transform_indices = @transform_3, window_bounds = array<i64: 8, 128>}, {pipeline_mode = #tpu.pipeline_mode<synchronous>, transform_indices = @transform_4, window_bounds = array<i64: 1, 128>}, {pipeline_mode = #tpu.pipeline_mode<synchronous>, transform_indices = @transform_5, window_bounds = array<i64: 128, 128>}, {pipeline_mode = #tpu.pipeline_mode<synchronous>, transform_indices = @transform_6, window_bounds = array<i64: 1, 128>}, {pipeline_mode = #tpu.pipeline_mode<synchronous>, transform_indices = @transform_7, window_bounds = array<i64: 128, 128>}, {pipeline_mode = #tpu.pipeline_mode<synchronous>, transform_indices = @transform_8, window_bounds = array<i64: 1, 128>}, {transform_indices = @transform_9, window_bounds = array<i64: 8, 128>}]} {
    %c0 = arith.constant 0 : index
    %c0_0 = arith.constant 0 : index
    %0 = vector.load %arg1[%c0, %c0_0] : memref<8x16xf32, #tpu.memory_space<vmem>>, vector<8x16xf32>
    %c0_1 = arith.constant 0 : index
    %c0_2 = arith.constant 0 : index
    %1 = vector.load %arg3[%c0_1, %c0_2] : memref<16x128xf32, #tpu.memory_space<vmem>>, vector<16x128xf32>
    %cst = arith.constant dense<0.000000e+00> : vector<8x128xf32>
    %2 = tpu.matmul %0, %1, %cst {dimension_numbers = #tpu.dot_dimension_numbers<[1], [0], [0], [1], [0, 0, 1, 1], [], []>} : vector<8x16xf32>, vector<16x128xf32>, vector<8x128xf32> -> vector<8x128xf32>
    %c0_3 = arith.constant 0 : index
    %c0_4 = arith.constant 0 : index
    %3 = vector.load %arg2[%c0_3, %c0_4] : memref<8x8xf32, #tpu.memory_space<vmem>>, vector<8x8xf32>
    %c0_5 = arith.constant 0 : index
    %c0_6 = arith.constant 0 : index
    %4 = vector.load %arg4[%c0_5, %c0_6] : memref<8x128xf32, #tpu.memory_space<vmem>>, vector<8x128xf32>
    %cst_7 = arith.constant dense<0.000000e+00> : vector<8x128xf32>
    %5 = tpu.matmul %3, %4, %cst_7 {dimension_numbers = #tpu.dot_dimension_numbers<[1], [0], [0], [1], [0, 0, 1, 1], [], []>} : vector<8x8xf32>, vector<8x128xf32>, vector<8x128xf32> -> vector<8x128xf32>
    %6 = arith.addf %2, %5 : vector<8x128xf32>
    %c0_8 = arith.constant 0 : index
    %c0_9 = arith.constant 0 : index
    %7 = vector.load %arg5[%c0_8, %c0_9] : memref<1x128xf32, #tpu.memory_space<vmem>>, vector<1x128xf32>
    %8 = vector.broadcast %7 : vector<1x128xf32> to vector<8x128xf32>
    %9 = arith.addf %6, %8 : vector<8x128xf32>
    %cst_10 = arith.constant 0.000000e+00 : f32
    %10 = vector.broadcast %cst_10 : f32 to vector<8x128xf32>
    %11 = arith.maximumf %9, %10 : vector<8x128xf32>
    %c0_11 = arith.constant 0 : index
    %c0_12 = arith.constant 0 : index
    %12 = vector.load %arg6[%c0_11, %c0_12] : memref<128x128xf32, #tpu.memory_space<vmem>>, vector<128x128xf32>
    %cst_13 = arith.constant dense<0.000000e+00> : vector<8x128xf32>
    %13 = tpu.matmul %11, %12, %cst_13 {dimension_numbers = #tpu.dot_dimension_numbers<[1], [0], [0], [1], [0, 0, 1, 1], [], []>} : vector<8x128xf32>, vector<128x128xf32>, vector<8x128xf32> -> vector<8x128xf32>
    %c0_14 = arith.constant 0 : index
    %c0_15 = arith.constant 0 : index
    %14 = vector.load %arg7[%c0_14, %c0_15] : memref<1x128xf32, #tpu.memory_space<vmem>>, vector<1x128xf32>
    %15 = vector.broadcast %14 : vector<1x128xf32> to vector<8x128xf32>
    %16 = arith.addf %13, %15 : vector<8x128xf32>
    %cst_16 = arith.constant 0.000000e+00 : f32
    %17 = vector.broadcast %cst_16 : f32 to vector<8x128xf32>
    %18 = arith.maximumf %16, %17 : vector<8x128xf32>
    %c0_17 = arith.constant 0 : index
    %c0_18 = arith.constant 0 : index
    %19 = vector.load %arg8[%c0_17, %c0_18] : memref<128x128xf32, #tpu.memory_space<vmem>>, vector<128x128xf32>
    %cst_19 = arith.constant dense<0.000000e+00> : vector<8x128xf32>
    %20 = tpu.matmul %18, %19, %cst_19 {dimension_numbers = #tpu.dot_dimension_numbers<[1], [0], [0], [1], [0, 0, 1, 1], [], []>} : vector<8x128xf32>, vector<128x128xf32>, vector<8x128xf32> -> vector<8x128xf32>
    %c0_20 = arith.constant 0 : index
    %c0_21 = arith.constant 0 : index
    %21 = vector.load %arg9[%c0_20, %c0_21] : memref<1x128xf32, #tpu.memory_space<vmem>>, vector<1x128xf32>
    %22 = vector.broadcast %21 : vector<1x128xf32> to vector<8x128xf32>
    %23 = arith.addf %20, %22 : vector<8x128xf32>
    %c0_22 = arith.constant 0 : index
    %c0_23 = arith.constant 0 : index
    %24 = vector.load %arg10[%c0_22, %c0_23] : memref<8x128xf32, #tpu.memory_space<vmem>>, vector<8x128xf32>
    tpu.vector_store %arg10[%c0_22, %c0_23], %23 {strides = array<i32>} : memref<8x128xf32, #tpu.memory_space<vmem>>, vector<8x128xf32>,
    return
  }
  func.func @transform_0(%arg0: i32) -> (i32, i32) {
    %c0_i32 = arith.constant 0 : i32
    %c0_i32_0 = arith.constant 0 : i32
    return %arg0, %c0_i32 : i32, i32
  }
  func.func @transform_1(%arg0: i32) -> (i32, i32) {
    %c0_i32 = arith.constant 0 : i32
    %c0_i32_0 = arith.constant 0 : i32
    return %arg0, %c0_i32 : i32, i32
  }
  func.func @transform_2(%arg0: i32) -> (i32, i32) {
    %c0_i32 = arith.constant 0 : i32
    %c0_i32_0 = arith.constant 0 : i32
    %c0_i32_1 = arith.constant 0 : i32
    return %c0_i32, %c0_i32_0 : i32, i32
  }
  func.func @transform_3(%arg0: i32) -> (i32, i32) {
    %c0_i32 = arith.constant 0 : i32
    %c0_i32_0 = arith.constant 0 : i32
    %c0_i32_1 = arith.constant 0 : i32
    return %c0_i32, %c0_i32_0 : i32, i32
  }
  func.func @transform_4(%arg0: i32) -> (i32, i32) {
    %c0_i32 = arith.constant 0 : i32
    %c0_i32_0 = arith.constant 0 : i32
    %c0_i32_1 = arith.constant 0 : i32
    return %c0_i32, %c0_i32_0 : i32, i32
  }
  func.func @transform_5(%arg0: i32) -> (i32, i32) {
    %c0_i32 = arith.constant 0 : i32
    %c0_i32_0 = arith.constant 0 : i32
    %c0_i32_1 = arith.constant 0 : i32
    return %c0_i32, %c0_i32_0 : i32, i32
  }
  func.func @transform_6(%arg0: i32) -> (i32, i32) {
    %c0_i32 = arith.constant 0 : i32
    %c0_i32_0 = arith.constant 0 : i32
    %c0_i32_1 = arith.constant 0 : i32
    return %c0_i32, %c0_i32_0 : i32, i32
  }
  func.func @transform_7(%arg0: i32) -> (i32, i32) {
    %c0_i32 = arith.constant 0 : i32
    %c0_i32_0 = arith.constant 0 : i32
    %c0_i32_1 = arith.constant 0 : i32
    return %c0_i32, %c0_i32_0 : i32, i32
  }
  func.func @transform_8(%arg0: i32) -> (i32, i32) {
    %c0_i32 = arith.constant 0 : i32
    %c0_i32_0 = arith.constant 0 : i32
    %c0_i32_1 = arith.constant 0 : i32
    return %c0_i32, %c0_i32_0 : i32, i32
  }
  func.func @transform_9(%arg0: i32) -> (i32, i32) {
    %c0_i32 = arith.constant 0 : i32
    %c0_i32_0 = arith.constant 0 : i32
    return %arg0, %c0_i32 : i32, i32
  }
}

</mosaic_0001>

<bundles_post_ra>
// kernel: tpu_custom_call.1
= control target key start
LH: loop header
LB: loop body
LE: loop exit
PB: predicated region body
PF: predicated region fallthrough
CT: control target
= control target key end

     0   :  { %14 = vsyncpa [#allocation3], 0  ;;  %s967_s0 = inlined_call_operand.hbm [shape: f32[8,16], index: 0, kind: input, shape index: {}]   ;;  %s968_s1 = inlined_call_operand.hbm [shape: f32[8,8], index: 1, kind: input, shape index: {}]   ;;  %s969_s2 = inlined_call_operand.hbm [shape: f32[16,128], index: 2, kind: input, shape index: {}]   ;;  %s970_s3 = inlined_call_operand.vmem [shape: f32[8,128], index: 3, kind: input, shape index: {}]   ;;  %s971_s4 = inlined_call_operand.vmem [shape: f32[1,128], index: 4, kind: input, shape index: {}]   ;;  %s972_s5 = inlined_call_operand.hbm [shape: f32[128,128], index: 5, kind: input, shape index: {}]   ;;  %s973_s6 = inlined_call_operand.vmem [shape: f32[1,128], index: 6, kind: input, shape index: {}]   ;;  %s974_s7 = inlined_call_operand.hbm [shape: f32[128,128], index: 7, kind: input, shape index: {}]   ;;  %s975_s8 = inlined_call_operand.vmem [shape: f32[1,128], index: 8, kind: input, shape index: {}]   ;;  %s976_s9 = inlined_call_operand.hbm [shape: f32[8,128], index: 9, kind: output, shape index: {}]  }
   0x1   :  { %15 = vsyncpa [#allocation6], 0 }
   0x2   :  { %16 = vsyncpa [#allocation9], 0 }
   0x3   :  { %17 = vsyncpa [#allocation4], 0  ;;  %s792_s30 = smov [#allocation5]   ;;  %s652_s13 = scalar_lea.hbm %s968_s1, 128 }
   0x4   :  { %s34_s10 = sshll.u32 %s792_s30, 4  ;;  %p653_p0 = scmp.ne.s32.totalorder %s968_s1, %s652_s13  ;;  %s35_s10 = int_to_ptr.vmem [resolvable:$true] %s34_s10 }
   0x5   :  { %p656_p1 = scmp.lt.u32.totalorder %s652_s13, %s968_s1 }
   0x7   :  { %p658_p2 = pnand %p656_p1, %p653_p0 }
   0x9   :  { %661 = shalt.err (!%p658_p2)
}
   0xa   :  { %s662_s18 = scalar_lea.vmem %s35_s10, 128  ;;  %p667_p4 = scmp.lt.s32.totalorder %s35_s10, %s35_s10 }
   0xb   :  { %p663_p3 = scmp.ne.s32.totalorder %s35_s10, %s662_s18  ;;  %p668_p5 = scmp.lt.s32.totalorder %s662_s18, %s662_s18 }
   0xd   :  { %p669_p6 = por %p668_p5, %p667_p4 }
   0xf   :  { %p670_p7 = pnand %p669_p6, %p663_p3 }
  0x11   :  { %673 = shalt.err (!%p670_p7)
}
  0x12   :  { %37 = dma.hbm_to_vmem [thread:$0]  %s968_s1, 128, %s35_s10, [#allocation6]  }
  0x13   :  { %s793_s21 = smov [#allocation8]   ;;  %s794_s23 = smov [#allocation2]  }
  0x14   :  { %s59_s22 = sshll.u32 %s793_s21, 4  ;;  %s24_s24 = sshll.u32 %s794_s23, 4  ;;  %s60_s22 = int_to_ptr.vmem [resolvable:$true] %s59_s22  ;;  %s25_s24 = int_to_ptr.vmem [resolvable:$true] %s24_s24 }
  0x15   :  { %s674_s27 = scalar_lea.hbm %s972_s5, 2048 }
  0x16   :  { %p675_p8 = scmp.ne.s32.totalorder %s972_s5, %s674_s27  ;;  %p678_p9 = scmp.lt.u32.totalorder %s674_s27, %s972_s5 }
  0x18   :  { %p680_p10 = pnand %p678_p9, %p675_p8 }
  0x1a   :  { %683 = shalt.err (!%p680_p10)
}
  0x1b   :  { %s684_s1 = scalar_lea.vmem %s60_s22, 2048  ;;  %p689_p12 = scmp.lt.s32.totalorder %s60_s22, %s60_s22 }
  0x1c   :  { %p685_p11 = scmp.ne.s32.totalorder %s60_s22, %s684_s1  ;;  %p690_p13 = scmp.lt.s32.totalorder %s684_s1, %s684_s1 }
  0x1e   :  { %p691_p0 = por %p690_p13, %p689_p12 }
  0x20   :  { %p692_p1 = pnand %p691_p0, %p685_p11 }
  0x22   :  { %695 = shalt.err (!%p692_p1)
}
  0x23   :  { %s795_s10 = smov 128   ;;  %s796_s12 = smov 8  }
  0x24   :  { %65 = dma.hbm_to_vmem [thread:$0]  %s972_s5, 2048, %s60_s22, [#allocation9], %s795_s10, %s795_s10, %s796_s12  }
  0x25   :  { %s696_s17 = scalar_lea.hbm %s967_s0, 128 }
  0x26   :  { %p697_p2 = scmp.ne.s32.totalorder %s967_s0, %s696_s17  ;;  %p700_p3 = scmp.lt.u32.totalorder %s696_s17, %s967_s0 }
  0x28   :  { %p702_p4 = pnand %p700_p3, %p697_p2 }
  0x2a   :  { %705 = shalt.err (!%p702_p4)
}
  0x2b   :  { %s706_s23 = scalar_lea.vmem %s25_s24, 128  ;;  %p711_p6 = scmp.lt.s32.totalorder %s25_s24, %s25_s24 }
  0x2c   :  { %p707_p5 = scmp.ne.s32.totalorder %s25_s24, %s706_s23  ;;  %p712_p7 = scmp.lt.s32.totalorder %s706_s23, %s706_s23 }
  0x2e   :  { %p713_p8 = por %p712_p7, %p711_p6 }
  0x30   :  { %p714_p9 = pnand %p713_p8, %p707_p5 }
  0x32   :  { %717 = shalt.err (!%p714_p9)
}
  0x33   :  { %27 = dma.hbm_to_vmem [thread:$0]  %s967_s0, 128, %s25_s24, [#allocation3]  }
  0x34   :  { %s797_s25 = smov [#allocation7]   ;;  %s798_s27 = smov [#allocation10]  }
  0x35   :  { %s43_s26 = sshll.u32 %s797_s25, 4  ;;  %s73_s28 = sshll.u32 %s798_s27, 4  ;;  %s44_s26 = int_to_ptr.vmem [resolvable:$true] %s43_s26  ;;  %s74_s28 = int_to_ptr.vmem [resolvable:$true] %s73_s28 }
  0x36   :  { %s718_s11 = scalar_lea.hbm %s969_s2, 256 }
  0x37   :  { %p719_p10 = scmp.ne.s32.totalorder %s969_s2, %s718_s11  ;;  %p722_p11 = scmp.lt.u32.totalorder %s718_s11, %s969_s2 }
  0x39   :  { %p724_p12 = pnand %p722_p11, %p719_p10 }
  0x3b   :  { %727 = shalt.err (!%p724_p12)
}
  0x3c   :  { %s728_s0 = scalar_lea.vmem %s44_s26, 256  ;;  %p733_p0 = scmp.lt.s32.totalorder %s44_s26, %s44_s26 }
  0x3d   :  { %p729_p13 = scmp.ne.s32.totalorder %s44_s26, %s728_s0  ;;  %p734_p1 = scmp.lt.s32.totalorder %s728_s0, %s728_s0 }
  0x3f   :  { %p735_p2 = por %p734_p1, %p733_p0 }
  0x41   :  { %p736_p3 = pnand %p735_p2, %p729_p13 }
  0x43   :  { %739 = shalt.err (!%p736_p3)
}
  0x44   :  { %49 = dma.hbm_to_vmem [thread:$0]  %s969_s2, 256, %s44_s26, [#allocation6], %s795_s10, %s795_s10, %s796_s12  }
  0x45   :  { %s740_s19 = scalar_lea.hbm %s974_s7, 2048 }
  0x46   :  { %p741_p4 = scmp.ne.s32.totalorder %s974_s7, %s740_s19  ;;  %p744_p5 = scmp.lt.u32.totalorder %s740_s19, %s974_s7 }
  0x48   :  { %p746_p6 = pnand %p744_p5, %p741_p4 }
  0x4a   :  { %749 = shalt.err (!%p746_p6)
}
  0x4b   :  { %s750_s22 = scalar_lea.vmem %s74_s28, 2048  ;;  %p755_p8 = scmp.lt.s32.totalorder %s74_s28, %s74_s28 }
  0x4c   :  { %p751_p7 = scmp.ne.s32.totalorder %s74_s28, %s750_s22  ;;  %p756_p9 = scmp.lt.s32.totalorder %s750_s22, %s750_s22 }
  0x4e   :  { %p757_p10 = por %p756_p9, %p755_p8 }
  0x50   :  { %p758_p11 = pnand %p757_p10, %p751_p7 }
  0x52   :  { %761 = shalt.err (!%p758_p11)
}
  0x53   :  { %79 = dma.hbm_to_vmem [thread:$0]  %s974_s7, 2048, %s74_s28, [#allocation9], %s795_s10, %s795_s10, %s796_s12  }
  0x54   :  { %784 = dma.done.wait [#allocation3], 128  }
  0x55   :  { %785 = vsyncadd [#allocation3], 4294967168 }
  0x56   :  { %786 = dma.done.wait [#allocation6], 384  }
  0x57   :  { %787 = vsyncadd [#allocation6], 4294966912 }
  0x58   :  { %788 = dma.done.wait [#allocation9], 4096  }
  0x59   :  { %789 = vsyncadd [#allocation9], 4294963200  ;;  %v799_v0 = vmov 0.0|0.0   ;;  %v800_v1 = vmov 0.0   ;;  %vm801_vm0 = vmmov 0   ;;  %vm102_vm1 = vcmask 64512  }
  0x5a   :  { %590 = vmatprep.subr.bf16.mxu1 %v799_v0  ;;  %508 = vmatprep.subr.mxu0 %v800_v1  ;;  %v98_v2 = vld [vmem:[#allocation7] sm:$0xff]  ;;  %v99_v3 = vld [vmem:[#allocation7 + $0x8] sm:$0xff]  ;;  %v101_v4 = vld [vmem:[%s970_s3] sm:$0xff]  ;;  %vm176_vm2 = vcmask 130048   ;;  %s802_s29 = smov [#allocation11]  }
  0x5b   :  { %510 = vmatprep.mubr.msk.f32.mxu0 %vm801_vm0, %v800_v1  ;;  %517 = vmatprep.mubr.msk.f32.mxu1 %vm801_vm0, %v800_v1  ;;  %v591_v5 = vpack.c.bf16 %v99_v3, %v98_v2  ;;  %v100_v6 = vld [vmem:[#allocation5] sm:$0xff]  ;;  %v259_v7 = vld [vmem:[#allocation8] sm:$0xff]  ;;  %v261_v9 = vld [vmem:[#allocation8 + $0x10] sm:$0xff]  ;;  %s453_s30 = sshll.u32 %s802_s29, 4  ;;  %s454_s30 = int_to_ptr.vmem [resolvable:$true] %s453_s30 }
  0x5c   :  { %509 = vmatpush3.msra.mxu0 %v101_v4  ;;  %v260_v8 = vld [vmem:[#allocation8 + $0x8] sm:$0xff]  ;;  %v262_v10 = vld [vmem:[#allocation8 + $0x18] sm:$0xff]  ;;  %v97_v11 = vld [vmem:[#allocation2] sm:$0xff]  ;;  %s762_s11 = scalar_lea.vmem %s454_s30, 128  ;;  %p767_p13 = scmp.lt.s32.totalorder %s454_s30, %s454_s30 }
  0x5d   :  { %511 = vmatmul.mubr.msk.f32.vlgmr.msra.gmra.mrb[0].mxu0 %vm102_vm1, %v100_v6  ;;  %593 = vmatprep.subr.bf16.mxu0 %v799_v0  ;;  %v594_v12 = vpack.c.bf16 %v260_v8, %v259_v7  ;;  %v597_v13 = vpack.c.bf16 %v262_v10, %v261_v9  ;;  %v263_v14 = vld [vmem:[#allocation8 + $0x20] sm:$0xff]  ;;  %v264_v15 = vld [vmem:[#allocation8 + $0x28] sm:$0xff]  ;;  %v265_v17 = vld [vmem:[#allocation8 + $0x30] sm:$0xff]  ;;  %p763_p12 = scmp.ne.s32.totalorder %s454_s30, %s762_s11  ;;  %p768_p0 = scmp.lt.s32.totalorder %s762_s11, %s762_s11 }
  0x5e   :  { %592 = vmatpush3.bf16.msra.mxu1 %v591_v5  ;;  %552 = vmatprep.mubr.msk.f32.mxu0 %vm801_vm0, %v800_v1  ;;  %v600_v16 = vpack.c.bf16 %v264_v15, %v263_v14  ;;  %v266_v18 = vld [vmem:[#allocation8 + $0x38] sm:$0xff]  ;;  %v267_v20 = vld [vmem:[#allocation8 + $0x40] sm:$0xff]  ;;  %v268_v21 = vld [vmem:[#allocation8 + $0x48] sm:$0xff] }
  0x5f   :  { %617 = vmatprep.subr.bf16.mxu1 %v799_v0  ;;  %595 = vmatpush3.bf16.msra.mxu0 %v594_v12  ;;  %v603_v19 = vpack.c.bf16 %v266_v18, %v265_v17  ;;  %v606_v22 = vpack.c.bf16 %v268_v21, %v267_v20  ;;  %v269_v23 = vld [vmem:[#allocation8 + $0x50] sm:$0xff]  ;;  %v270_v24 = vld [vmem:[#allocation8 + $0x58] sm:$0xff]  ;;  %v271_v26 = vld [vmem:[#allocation8 + $0x60] sm:$0xff]  ;;  %p769_p1 = por %p768_p0, %p767_p13 }
  0x60   :  { %596 = vmatprep.subr.bf16.mxu0 %v799_v0  ;;  %v609_v25 = vpack.c.bf16 %v270_v24, %v269_v23  ;;  %v272_v27 = vld [vmem:[#allocation8 + $0x68] sm:$0xff]  ;;  %v273_v29 = vld [vmem:[#allocation8 + $0x70] sm:$0xff]  ;;  %v274_v30 = vld [vmem:[#allocation8 + $0x78] sm:$0xff] }
  0x61   :  { %518 = vmatmul.mubr.msk.f32.vlgmr.msra.gmra.mrb[0].mxu1 %vm176_vm2, %v97_v11  ;;  %v612_v28 = vpack.c.bf16 %v272_v27, %v271_v26  ;;  %v615_v31 = vpack.c.bf16 %v274_v30, %v273_v29  ;;  %v353_v32 = vld [vmem:[#allocation10] sm:$0xff]  ;;  %v354_v33 = vld [vmem:[#allocation10 + $0x8] sm:$0xff]  ;;  %v355_v34 = vld [vmem:[#allocation10 + $0x10] sm:$0xff]  ;;  %p770_p2 = pnand %p769_p1, %p763_p12 }
  0x62   :  { %587 = vmatprep.mubr.msk.f32.mxu1 %vm801_vm0, %v800_v1  ;;  %v618_v35 = vpack.c.bf16 %v354_v33, %v353_v32  ;;  %v356_v36 = vld [vmem:[#allocation10 + $0x18] sm:$0xff]  ;;  %v357_v38 = vld [vmem:[#allocation10 + $0x20] sm:$0xff]  ;;  %v358_v39 = vld [vmem:[#allocation10 + $0x28] sm:$0xff] }
  0x63   :  { %598 = vmatpush3.bf16.msra.mxu0 %v597_v13  ;;  %v621_v37 = vpack.c.bf16 %v356_v36, %v355_v34  ;;  %v624_v40 = vpack.c.bf16 %v358_v39, %v357_v38  ;;  %v359_v41 = vld [vmem:[#allocation10 + $0x30] sm:$0xff]  ;;  %v360_v42 = vld [vmem:[#allocation10 + $0x38] sm:$0xff]  ;;  %v361_v44 = vld [vmem:[#allocation10 + $0x40] sm:$0xff] }
  0x64   :  { %599 = vmatprep.subr.bf16.mxu0 %v799_v0  ;;  %619 = vmatpush3.bf16.msra.mxu1 %v618_v35  ;;  %v627_v43 = vpack.c.bf16 %v360_v42, %v359_v41  ;;  %v362_v45 = vld [vmem:[#allocation10 + $0x48] sm:$0xff]  ;;  %v363_v47 = vld [vmem:[#allocation10 + $0x50] sm:$0xff]  ;;  %v364_v48 = vld [vmem:[#allocation10 + $0x58] sm:$0xff] }
  0x65   :  { %620 = vmatprep.subr.bf16.mxu1 %v799_v0  ;;  %v630_v46 = vpack.c.bf16 %v362_v45, %v361_v44  ;;  %v633_v49 = vpack.c.bf16 %v364_v48, %v363_v47  ;;  %v365_v50 = vld [vmem:[#allocation10 + $0x60] sm:$0xff]  ;;  %v366_v51 = vld [vmem:[#allocation10 + $0x68] sm:$0xff]  ;;  %v367_v61 = vld [vmem:[#allocation10 + $0x70] sm:$0xff] }
  0x66   :  { %v636_v52 = vpack.c.bf16 %v366_v51, %v365_v50  ;;  %v466_v56 = vld [vmem:[%s971_s4] ss:$0 sm:$0xff]  ;;  %v368_v62 = vld [vmem:[#allocation10 + $0x78] sm:$0xff] }
  0x67   :  { %601 = vmatpush3.bf16.msra.mxu0 %v600_v16  ;;  %v639_v63 = vpack.c.bf16 %v368_v62, %v367_v61  ;;  %v468_v5 = vld [vmem:[%s975_s8] ss:$0 sm:$0xff] }
  0x68   :  { %602 = vmatprep.subr.bf16.mxu0 %v799_v0  ;;  %622 = vmatpush3.bf16.msra.mxu1 %v621_v37 }
  0x69   :  { %623 = vmatprep.subr.bf16.mxu1 %v799_v0 }
  0x6b   :  { %604 = vmatpush3.bf16.msra.mxu0 %v603_v19 }
  0x6c   :  { %605 = vmatprep.subr.bf16.mxu0 %v799_v0  ;;  %625 = vmatpush3.bf16.msra.mxu1 %v624_v40 }
  0x6d   :  { %626 = vmatprep.subr.bf16.mxu1 %v799_v0 }
  0x6f   :  { %607 = vmatpush3.bf16.msra.mxu0 %v606_v22 }
  0x70   :  { %608 = vmatprep.subr.bf16.mxu0 %v799_v0  ;;  %628 = vmatpush3.bf16.msra.mxu1 %v627_v43 }
  0x71   :  { %629 = vmatprep.subr.bf16.mxu1 %v799_v0 }
  0x73   :  { %610 = vmatpush3.bf16.msra.mxu0 %v609_v25 }
  0x74   :  { %611 = vmatprep.subr.bf16.mxu0 %v799_v0  ;;  %631 = vmatpush3.bf16.msra.mxu1 %v630_v46 }
  0x75   :  { %632 = vmatprep.subr.bf16.mxu1 %v799_v0 }
  0x77   :  { %613 = vmatpush3.bf16.msra.mxu0 %v612_v28 }
  0x78   :  { %614 = vmatprep.subr.bf16.mxu0 %v799_v0  ;;  %634 = vmatpush3.bf16.msra.mxu1 %v633_v49 }
  0x79   :  { %635 = vmatprep.subr.bf16.mxu1 %v799_v0 }
  0x7b   :  { %616 = vmatpush3.bf16.msra.mxu0 %v615_v31 }
  0x7c   :  { %637 = vmatpush3.bf16.msra.mxu1 %v636_v52 }
  0x7d   :  { %638 = vmatprep.subr.bf16.mxu1 %v799_v0  ;;  %v467_v0 = vld [vmem:[%s973_s6] ss:$0 sm:$0xff] }
  0x80   :  { %640 = vmatpush3.bf16.msra.mxu1 %v639_v63 }
 0x130   :  { %v172_v53 = vpop.f32.mrb[0].mxu0 }
 0x131   :  { %v512_v54 = vpop.f32.mrb[1].mxu0 }
 0x134   :  { %v246_v55 = vpop.f32.mrb[0].mxu1 }
 0x135   :  { %v247_v57 = vadd.f32 %v246_v55, %v172_v53  ;;  %v519_v58 = vpop.f32.mrb[1].mxu1 }
 0x137   :  { %v257_v59 = vadd.f32 %v466_v56, %v247_v57 }
 0x139   :  { %v258_v60 = vmax.f32 %v257_v59, 0.0 }
 0x13b   :  { %553 = vmatmul.mubr.f32.vlgmr.msra.gmra.mrb[2].mxu0 %v258_v60 }
 0x20e   :  { %v348_v1 = vpop.f32.mrb[2].mxu0 }
 0x20f   :  { %v349_v2 = vadd.f32 %v467_v0, %v348_v1  ;;  %v554_v3 = vpop.f32.mrb[3].mxu0 }
 0x211   :  { %v352_v4 = vmax.f32 %v349_v2, 0.0 }
 0x213   :  { %588 = vmatmul.mubr.f32.vlgmr.msra.gmra.mrb[2].mxu1 %v352_v4 }
 0x2e6   :  { %v442_v6 = vpop.f32.mrb[2].mxu1 }
 0x2e7   :  { %v443_v7 = vadd.f32 %v468_v5, %v442_v6  ;;  %v589_v8 = vpop.f32.mrb[3].mxu1 }
 0x2e9   :  { %446 = vst [vmem:[#allocation11] sm:$0xff] %v443_v7 }
 0x2ea   :  { %773 = shalt.err (!%p770_p2)
}
 0x2eb   :  { %s774_s13 = scalar_lea.hbm %s976_s9, 128 }
 0x2ec   :  { %p775_p3 = scmp.ne.s32.totalorder %s976_s9, %s774_s13  ;;  %p778_p4 = scmp.lt.u32.totalorder %s774_s13, %s976_s9 }
 0x2ee   :  { %p780_p5 = pnand %p778_p4, %p775_p3 }
 0x2f0   :  { %783 = shalt.err (!%p780_p5)
}
 0x2f1   :  { %456 = dma.vmem_to_hbm [thread:$0]  %s454_s30, 128, %s976_s9, [#allocation4]  }
 0x2f2   :  { %790 = dma.done.wait [#allocation4], 128  }
 0x2f3   :  { %791 = vsyncadd [#allocation4], 4294967168 }
 0x2f4   :  { %460 = vsyncpa [#allocation3], 1 }
 0x2f5   :  { %461 = vsyncpa [#allocation6], 1 }
 0x2f6   :  { %462 = vsyncpa [#allocation9], 1 }
 0x2f7   :  { %463 = vsyncpa [#allocation4], 1 }

</bundles_post_ra>
